<compile_context>
chip_gen: v5e
topology: v5e:2x2
jax: 0.10.0
libtpu: 0.0.40
codegen_flags: <defaults>
</compile_context>

<pallas_src>
import jax
import jax.numpy as jnp
from jax.experimental import pallas as pl
from jax.experimental.pallas import tpu as pltpu

NUM_CLASSES = 35  # matches the PyTorch module's num_classes


def custom_bce_loss(logits, labels, loss_weights, *, block_b=512):
    """Pallas wrapper.

    logits/labels: (B, C) any float dtype; loss_weights: (C,).
    Returns scalar f32 loss.
    """
    B, C = logits.shape
    n_elems = B * C

    # --- lane-dense layout plumbing (batch -> lane axis) ---------------------
    lt = jnp.transpose(logits)            # (C, B), native dtype
    lb = jnp.transpose(labels)            # (C, B), native dtype
    w2d = loss_weights.reshape(C, 1)      # (C, 1), broadcast over lanes in-kernel

    # Tile size along the batch/lane axis: multiple of 128, no bigger than needed.
    assert block_b % 128 == 0, "block_b must be a multiple of 128"
    tb = min(block_b, pl.cdiv(B, 128) * 128)
    grid_b = pl.cdiv(B, tb)
    b_padded = grid_b * tb
    if b_padded != B:
        pad = b_padded - B
        lt = jnp.pad(lt, ((0, 0), (0, pad)))
        lb = jnp.pad(lb, ((0, 0), (0, pad)))

    def kernel(logits_ref, labels_ref, w_ref, out_ref, acc_ref):
        pid = pl.program_id(0)

        @pl.when(pid == 0)
        def _():
            acc_ref[...] = jnp.zeros_like(acc_ref)

        # Cast AFTER the load: inputs stay narrow across the HBM->VMEM DMA.
        x = logits_ref[...].astype(jnp.float32)    # (C, TB)
        y = labels_ref[...].astype(jnp.float32)    # (C, TB)
        w = w_ref[...].astype(jnp.float32)         # (C, 1) -> lane broadcast

        probs = jax.nn.sigmoid(x)
        term = y * jnp.log(probs + 1e-6) + (1.0 - y) * jnp.log(1.0 - probs + 1e-6)
        weighted = w * term                        # (C, TB)

        # Mask padded batch columns (only the ragged last tile has any).
        col = pid * tb + jax.lax.broadcasted_iota(jnp.int32, weighted.shape, 1)
        weighted = jnp.where(col < B, weighted, 0.0)

        # Elementwise (VPU-only) accumulation; no per-tile cross-lane reduce.
        acc_ref[...] += weighted

        @pl.when(pid == pl.num_programs(0) - 1)
        def _():
            # Single XLU reduce + finalize at the end.
            out_ref[0, 0] = -jnp.sum(acc_ref[...]) / jnp.float32(n_elems)

    out = pl.pallas_call(
        kernel,
        out_shape=jax.ShapeDtypeStruct((1, 1), jnp.float32),
        grid_spec=pltpu.PrefetchScalarGridSpec(
            num_scalar_prefetch=0,
            grid=(grid_b,),
            in_specs=[
                pl.BlockSpec((C, tb), lambda i: (0, i)),   # logits (C, B) tiles
                pl.BlockSpec((C, tb), lambda i: (0, i)),   # labels (C, B) tiles
                pl.BlockSpec((C, 1), lambda i: (0, 0)),    # weights, resident
            ],
            out_specs=pl.BlockSpec(memory_space=pltpu.SMEM),  # scalar result
            scratch_shapes=[pltpu.VMEM((C, tb), jnp.float32)],
        ),
        compiler_params=pltpu.CompilerParams(
            dimension_semantics=("arbitrary",),  # reduction axis w/ resident acc
        ),
    )(lt, lb, w2d)
    return out[0, 0]


def _reference(logits, labels, loss_weights):
    probs = jax.nn.sigmoid(logits.astype(jnp.float32))
    labels = labels.astype(jnp.float32)
    return -jnp.mean(
        loss_weights
        * (labels * jnp.log(probs + 1e-6) + (1.0 - labels) * jnp.log(1.0 - probs + 1e-6))
    )


if __name__ == "__main__":
    key = jax.random.PRNGKey(0)
    k1, k2, k3 = jax.random.split(key, 3)

    # Small-ish batch that exercises multiple grid tiles + a ragged masked tile.
    B = 333
    logits = jax.random.normal(k1, (B, NUM_CLASSES), dtype=jnp.float32)
    labels = (jax.random.uniform(k2, (B, NUM_CLASSES)) > 0.5).astype(jnp.float32)
    # Deterministic synthetic per-class loss weights (undefined in the PyTorch code).
    loss_weights = jax.random.uniform(
        k3, (NUM_CLASSES,), minval=0.5, maxval=1.5, dtype=jnp.float32
    )

    # Multi-tile path (grid=3, last tile masked).
    loss = custom_bce_loss(logits, labels, loss_weights, block_b=128)
    jax.block_until_ready(loss)
    ref = _reference(logits, labels, loss_weights)
    assert jnp.allclose(loss, ref, rtol=1e-5, atol=1e-5), (loss, ref)

    # Tiny-batch path (single padded tile), default block size.
    loss_small = custom_bce_loss(logits[:8], labels[:8], loss_weights)
    jax.block_until_ready(loss_small)
    ref_small = _reference(logits[:8], labels[:8], loss_weights)
    assert jnp.allclose(loss_small, ref_small, rtol=1e-5, atol=1e-5), (loss_small, ref_small)

    print("KERNEL_OK")
</pallas_src>

<mosaic_0001>
module attributes {stable_mosaic.version = 11 : i64} {
  func.func @kernel(%arg0: i32, %arg1: memref<35x128xf32, #tpu.memory_space<vmem>>, %arg2: memref<35x128xf32, #tpu.memory_space<vmem>>, %arg3: memref<35x1xf32, #tpu.memory_space<vmem>>, %arg4: memref<1x1xf32, #tpu.memory_space<smem>>, %arg5: memref<35x128xf32, #tpu.memory_space<vmem>>) attributes {dimension_semantics = [#tpu.dimension_semantics<arbitrary>], iteration_bounds = array<i64: 3>, scalar_prefetch = 0 : i64, scratch_operands = 1 : i64, tpu.core_type = #tpu.core_type<tc>, window_params = [{transform_indices = @transform_0, window_bounds = array<i64: 35, 128>}, {transform_indices = @transform_1, window_bounds = array<i64: 35, 128>}, {pipeline_mode = #tpu.pipeline_mode<synchronous>, transform_indices = @transform_2, window_bounds = array<i64: 35, 1>}, {transform_indices = @transform_3, window_bounds = array<i64: 1, 1>}]} {
    %c0_i32 = arith.constant 0 : i32
    %0 = arith.cmpi eq, %arg0, %c0_i32 : i32
    %1 = arith.extui %0 : i1 to i32
    %c0_i32_0 = arith.constant 0 : i32
    %2 = arith.cmpi ne, %1, %c0_i32_0 : i32
    scf.if %2 {
      %cst_16 = arith.constant 0.000000e+00 : f32
      %40 = vector.broadcast %cst_16 : f32 to vector<35x128xf32>
      %c0_17 = arith.constant 0 : index
      %c0_18 = arith.constant 0 : index
      %41 = vector.load %arg5[%c0_17, %c0_18] : memref<35x128xf32, #tpu.memory_space<vmem>>, vector<35x128xf32>
      tpu.vector_store %arg5[%c0_17, %c0_18], %40 {strides = array<i32>} : memref<35x128xf32, #tpu.memory_space<vmem>>, vector<35x128xf32>,
    } else {
    }
    %c0 = arith.constant 0 : index
    %c0_1 = arith.constant 0 : index
    %3 = vector.load %arg1[%c0, %c0_1] : memref<35x128xf32, #tpu.memory_space<vmem>>, vector<35x128xf32>
    %c0_2 = arith.constant 0 : index
    %c0_3 = arith.constant 0 : index
    %4 = vector.load %arg2[%c0_2, %c0_3] : memref<35x128xf32, #tpu.memory_space<vmem>>, vector<35x128xf32>
    %c0_4 = arith.constant 0 : index
    %c0_5 = arith.constant 0 : index
    %5 = vector.load %arg3[%c0_4, %c0_5] : memref<35x1xf32, #tpu.memory_space<vmem>>, vector<35x1xf32>
    %6 = arith.negf %3 : vector<35x128xf32>
    %7 = math.exp %6 : vector<35x128xf32>
    %cst = arith.constant 1.000000e+00 : f32
    %8 = vector.broadcast %cst : f32 to vector<35x128xf32>
    %9 = arith.addf %8, %7 : vector<35x128xf32>
    %10 = arith.divf %8, %9 : vector<35x128xf32>
    %cst_6 = arith.constant 9.99999997E-7 : f32
    %11 = vector.broadcast %cst_6 : f32 to vector<35x128xf32>
    %12 = arith.addf %10, %11 : vector<35x128xf32>
    %13 = math.log %12 : vector<35x128xf32>
    %14 = arith.mulf %4, %13 : vector<35x128xf32>
    %cst_7 = arith.constant 1.000000e+00 : f32
    %15 = vector.broadcast %cst_7 : f32 to vector<35x128xf32>
    %16 = arith.subf %15, %4 : vector<35x128xf32>
    %cst_8 = arith.constant 1.000000e+00 : f32
    %17 = vector.broadcast %cst_8 : f32 to vector<35x128xf32>
    %18 = arith.subf %17, %10 : vector<35x128xf32>
    %cst_9 = arith.constant 9.99999997E-7 : f32
    %19 = vector.broadcast %cst_9 : f32 to vector<35x128xf32>
    %20 = arith.addf %18, %19 : vector<35x128xf32>
    %21 = math.log %20 : vector<35x128xf32>
    %22 = arith.mulf %16, %21 : vector<35x128xf32>
    %23 = arith.addf %14, %22 : vector<35x128xf32>
    %24 = vector.broadcast %5 : vector<35x1xf32> to vector<35x128xf32>
    %25 = arith.mulf %24, %23 : vector<35x128xf32>
    %c128_i32 = arith.constant 128 : i32
    %26 = arith.muli %arg0, %c128_i32 : i32
    %27 = tpu.iota {dimensions = array<i32: 1>} : vector<35x128xi32>
    %28 = vector.broadcast %26 : i32 to vector<35x128xi32>
    %29 = arith.addi %28, %27 : vector<35x128xi32>
    %c333_i32 = arith.constant 333 : i32
    %30 = vector.broadcast %c333_i32 : i32 to vector<35x128xi32>
    %31 = arith.cmpi slt, %29, %30 : vector<35x128xi32>
    %cst_10 = arith.constant 0.000000e+00 : f32
    %32 = vector.broadcast %cst_10 : f32 to vector<35x128xf32>
    %33 = arith.select %31, %25, %32 : vector<35x128xi1>, vector<35x128xf32>
    %c0_11 = arith.constant 0 : index
    %c0_12 = arith.constant 0 : index
    %34 = vector.load %arg5[%c0_11, %c0_12] : memref<35x128xf32, #tpu.memory_space<vmem>>, vector<35x128xf32>
    %35 = arith.addf %34, %33 : vector<35x128xf32>
    %c0_13 = arith.constant 0 : index
    %c0_14 = arith.constant 0 : index
    %36 = vector.load %arg5[%c0_13, %c0_14] : memref<35x128xf32, #tpu.memory_space<vmem>>, vector<35x128xf32>
    tpu.vector_store %arg5[%c0_13, %c0_14], %35 {strides = array<i32>} : memref<35x128xf32, #tpu.memory_space<vmem>>, vector<35x128xf32>,
    %c2_i32 = arith.constant 2 : i32
    %37 = arith.cmpi eq, %arg0, %c2_i32 : i32
    %38 = arith.extui %37 : i1 to i32
    %c0_i32_15 = arith.constant 0 : i32
    %39 = arith.cmpi ne, %38, %c0_i32_15 : i32
    scf.if %39 {
      %c0_16 = arith.constant 0 : index
      %c0_17 = arith.constant 0 : index
      %40 = vector.load %arg5[%c0_16, %c0_17] : memref<35x128xf32, #tpu.memory_space<vmem>>, vector<35x128xf32>
      %41 = vector.shape_cast %40 : vector<35x128xf32> to vector<1x35x128xf32>
      %cst_18 = arith.constant dense<0.000000e+00> : vector<1xf32>
      %42 = vector.multi_reduction <add>, %41, %cst_18 [1, 2] : vector<1x35x128xf32> to vector<1xf32>
      %43 = vector.shape_cast %42 : vector<1xf32> to vector<1x1x1xf32>
      %44 = vector.extract %43[0, 0, 0] : f32 from vector<1x1x1xf32>
      %cst_19 = arith.constant 0.000000e+00 : f32
      %45 = arith.subf %cst_19, %44 : f32
      %cst_20 = arith.constant 1.165500e+04 : f32
      %46 = arith.divf %45, %cst_20 : f32
      %c0_21 = arith.constant 0 : index
      %c0_22 = arith.constant 0 : index
      %47 = memref.load %arg4[%c0_21, %c0_22] : memref<1x1xf32, #tpu.memory_space<smem>>
      memref.store %46, %arg4[%c0_21, %c0_22] : memref<1x1xf32, #tpu.memory_space<smem>>
    } else {
    }
    return
  }
  func.func @transform_0(%arg0: i32) -> (i32, i32) {
    %c0_i32 = arith.constant 0 : i32
    %c0_i32_0 = arith.constant 0 : i32
    return %c0_i32, %arg0 : i32, i32
  }
  func.func @transform_1(%arg0: i32) -> (i32, i32) {
    %c0_i32 = arith.constant 0 : i32
    %c0_i32_0 = arith.constant 0 : i32
    return %c0_i32, %arg0 : i32, i32
  }
  func.func @transform_2(%arg0: i32) -> (i32, i32) {
    %c0_i32 = arith.constant 0 : i32
    %c0_i32_0 = arith.constant 0 : i32
    %c0_i32_1 = arith.constant 0 : i32
    return %c0_i32, %c0_i32_0 : i32, i32
  }
  func.func @transform_3(%arg0: i32) -> (i32, i32) {
    %c0_i32 = arith.constant 0 : i32
    %c0_i32_0 = arith.constant 0 : i32
    %c0_i32_1 = arith.constant 0 : i32
    return %c0_i32, %c0_i32_0 : i32, i32
  }
}

</mosaic_0001>

<bundles_post_ra>
// kernel: tpu_custom_call.1
= control target key start
LH: loop header
LB: loop body
LE: loop exit
PB: predicated region body
PF: predicated region fallthrough
CT: control target
= control target key end

     0   :  { %8 = vsyncpa [#allocation4], 0  ;;  %s1083_s0 = inlined_call_operand.hbm [shape: f32[35,384], index: 0, kind: input, shape index: {}]   ;;  %s1084_s1 = inlined_call_operand.hbm [shape: f32[35,384], index: 1, kind: input, shape index: {}]   ;;  %s1085_s2 = inlined_call_operand.vmem [shape: f32[35,1], index: 2, kind: input, shape index: {}]   ;;  %s1086_s3 = inlined_call_operand.hbm [shape: f32[1,1], index: 3, kind: output, shape index: {}]  }
   0x1   :  { %10 = vsyncpa [#allocation4 + $0x1], 0 }
   0x2   :  { %11 = vsyncpa [#allocation7], 0 }
   0x3   :  { %13 = vsyncpa [#allocation7 + $0x1], 0 }
   0x4   :  { %14 = vsyncpa [#allocation5], 0  ;;  %s838_s12 = smov 0   ;;  %s840_s13 = smov 0  }
   0x5   :  { %s842_s14 = smov 0   ;;  %s844_s15 = smov 0  }
   0x6 LB: > { %s857_s16 = sadd.s32 4294967295, %s809_s15   ;;  %s860_s17 = sadd.s32 1, %s809_s15   ;;  %s809_s15 = sphi %s844_s15, %s1101_s15   ;;  %s805_s14 = sphi %s842_s14, %s1100_s14   ;;  %s801_s13 = sphi %s840_s13, %s1099_s13   ;;  %s797_s12 = sphi %s838_s12, %s1098_s12  }
   0x7   : > { %s24_s18 = ssub.s32 %s809_s15, %s860_s17  ;;  %s27_s19 = sadd.s32 1, %s805_s14 }
   0x8   : > { %p25_p0 = scmp.eq.s32.totalorder %s24_s18, 0  ;;  %p34_p1 = scmp.ne.s32.totalorder %s805_s14, %s801_s13 }
   0x9   : > { %p35_p2 = scmp.eq.s32.totalorder %s809_s15, 0  ;;  %p40_p3 = scmp.ne.s32.totalorder %s801_s13, %s797_s12 }
   0xa   : > { %s870_s20 = scalar_select %p25_p0, %s805_s14, %s27_s19  }
   0xb   : > { %p36_p4 = por %p35_p2, %p34_p1  ;;  %p41_p5 = scmp.eq.s32.totalorder %s857_s16, 0 }
   0xc   : > { %p606_p6 = scmp.lt.s32.totalorder %s809_s15, 3  ;;  %s879_s22 = sand.u32 1, %s805_s14  }
   0xd   : > { %p874_p7 = por %p41_p5, %p40_p3  ;;  %s584_s23 = smul.u32 40, %s879_s22 }
   0xe   : > { %s569_s24 = sshll.u32 %s809_s15, 3  ;;  %p883_p8 = pnand %p606_p6, %p36_p4 }
   0xf   : > { %s143_s28 = scalar_lea.hbm %s1083_s0, %s569_s24  ;;  %s139_s30 = scalar_lea.vmem [#allocation3], %s584_s23 }
  0x10   : > { %s144_s29 = sshll.u32 %s143_s28, 4  ;;  %s146_s4 = sshll.u32 %s139_s30, 4  ;;  %s145_s29 = int_to_ptr.hbm [resolvable:$true] %s144_s29  ;;  %s147_s4 = int_to_ptr.vmem [resolvable:$true] %s146_s4 }
  0x11   : > { %s136_s5 = scalar_lea.sflag [#allocation4], %s879_s22  ;;  %s693_s6 = sshra.s32 %s145_s29, 4  ;;  %s694_s6 = int_to_ptr.hbm [resolvable:$true] %s693_s6 }
  0x12   : > { %s695_s7 = scalar_lea.hbm %s694_s6, 40  ;;  %p697_p10 = pneg %p883_p8 }
  0x13   : > { %p696_p9 = scmp.ne.s32.totalorder %s694_s6, %s695_s7  ;;  %s700_s10 = scalar_lea.hbm %s1083_s0, 120 }
  0x14   : > { %p701_p13 = scmp.lt.s32.totalorder %s694_s6, %s1083_s0  ;;  %p702_p0 = scmp.lt.s32.totalorder %s700_s10, %s695_s7 }
  0x15   : > { %p698_p11 = pnand %p697_p10, %p696_p9 }
  0x16   : > { %p703_p1 = por %p702_p0, %p701_p13 }
  0x17   : > { %p699_p12 = pneg %p698_p11 }
  0x19   : > { %p704_p2 = pnand %p703_p1, %p699_p12 }
  0x1b   : > { %707 = shalt.err (!%p704_p2)
}
  0x1c   : > { %s811_s18 = smov 384   ;;  %s812_s19 = smov 128  }
  0x1d   : > { %s813_s26 = smov 8   ;;  %p571_p3 = scmp.ge.s32.totalorder %s809_s15, 1 }
  0x1e   : > { %602 = dma.hbm_to_vmem [thread:$0]  (!%p883_p8), %s145_s29, 640, %s147_s4, %s136_s5, %s811_s18, %s812_s19, %s813_s26  }
  0x1f   : > { %p175_p4 = scmp.lt.s32.totalorder %s809_s15, 4  ;;  %s164_s6 = scalar_lea.hbm %s1084_s1, %s569_s24 }
  0x20   : > { %s165_s7 = sshll.u32 %s164_s6, 4  ;;  %s160_s8 = scalar_lea.vmem [#allocation6], %s584_s23  ;;  %s166_s7 = int_to_ptr.hbm [resolvable:$true] %s165_s7 }
  0x21   : > { %p912_p5 = pnand %p571_p3, %p175_p4  ;;  %s167_s9 = sshll.u32 %s160_s8, 4  ;;  %s168_s9 = int_to_ptr.vmem [resolvable:$true] %s167_s9 }
  0x22   : > { %s157_s10 = scalar_lea.sflag [#allocation7], %s879_s22  ;;  %s723_s11 = sshra.s32 %s166_s7, 4  ;;  %s724_s11 = int_to_ptr.hbm [resolvable:$true] %s723_s11 }
  0x23   : > { %s725_s29 = scalar_lea.hbm %s724_s11, 40  ;;  %s730_s5 = scalar_lea.hbm %s1084_s1, 120 }
  0x24   : > { %p726_p6 = scmp.ne.s32.totalorder %s724_s11, %s725_s29  ;;  %p731_p12 = scmp.lt.s32.totalorder %s724_s11, %s1084_s1 }
  0x25   : > { %p732_p13 = scmp.lt.s32.totalorder %s730_s5, %s725_s29 }
  0x26   : > { %p728_p9 = pnand %p726_p6, %p697_p10 }
  0x27   : > { %p733_p0 = por %p732_p13, %p731_p12 }
  0x28   : > { %p729_p11 = pneg %p728_p9 }
  0x2a   : > { %p734_p1 = pnand %p733_p0, %p729_p11 }
  0x2c   : > { %737 = shalt.err (!%p734_p1)
}
  0x2d   : > { %605 = dma.hbm_to_vmem [thread:$0]  (!%p883_p8), %s166_s7, 640, %s168_s9, %s157_s10, %s811_s18, %s812_s19, %s813_s26  }
  0x2e   : > { %179 = sbr.rel (%p912_p5) target bundleno = 403 (0x193), region = 32  ;;  %s181_s22 = sand.u32 (!%p912_p5), 1, %s801_s13  }
  0x2f   : > { %s586_s23 = smul.u32 (!%p912_p5), 40, %s181_s22  ;;  %s182_s28 = scalar_lea.sflag (!%p912_p5), [#allocation4], %s181_s22 }
  0x31   : > { %s940_s30 = scalar_lea.vmem (!%p912_p5), [#allocation3], %s586_s23 }
  0x33   : > { %784 = dma.done.wait (%p874_p7), %s182_s28, 640  }
  0x34   : > { %786 = vsyncadd (%p874_p7), %s182_s28, 4294966656  ;;  %s192_s25 = scalar_lea.sflag [#allocation7], %s181_s22  ;;  %s946_s6 = scalar_lea.vmem [#allocation6], %s586_s23 }
  0x35   : > { %788 = dma.done.wait (%p874_p7), %s192_s25, 640  }
  0x36   : > { %790 = vsyncadd (%p874_p7), %s192_s25, 4294966656  ;;  %p572_p8 = scmp.ne.s32.totalorder %s857_s16, 0 }
  0x38   : > { %222 = sbr.rel (%p572_p8) target bundleno = 67 (0x43), region = 44 }
  0x3d   : > { %v814_v0 = vmov 0.0  }
  0x3e   : > { %223 = vst [vmem:[#allocation2 + $0x8] sm:$0xff] %v814_v0 }
  0x3f   : > { %224 = vst [vmem:[#allocation2] sm:$0xff] %v814_v0 }
  0x40   : > { %225 = vst [vmem:[#allocation2 + $0x20] sm:$0xff] %v814_v0 }
  0x41   : > { %226 = vst [vmem:[#allocation2 + $0x10] sm:$0xff] %v814_v0 }
  0x42   : > { %227 = vst [vmem:[#allocation2 + $0x18] sm:$0x7] %v814_v0 }
  0x43 PF: > { %v240_v1 = vld [vmem:[%s1085_s2 + $0x10] sm:$0xff]  ;;  %v238_v2 = vld [vmem:[%s1085_s2] sm:$0xff]  ;;  %v815_v3 = vmov 0   ;;  %v241_v5 = vld [vmem:[%s1085_s2 + $0x18] sm:$0xff]  ;;  %s578_s29 = sshll.u32 %s857_s16, 7  ;;  %p579_p7 = scmp.ne.s32.totalorder %s857_s16, 2 }
  0x44   : > { %649 = vset.pattern.permute.xlu1 %v815_v3  ;;  %648 = vset.pattern.permute.xlu0 %v815_v3  ;;  %v242_v4 = vld [vmem:[%s1085_s2 + $0x20] sm:$0x7]  ;;  %v239_v6 = vld [vmem:[%s1085_s2 + $0x8] sm:$0xff]  ;;  %v229_v14 = vld [vmem:[%s940_s30 + $0x8] sm:$0xff] }
  0x45   : > { %405 = vperm.xlu1 %649, %v240_v1   ;;  %395 = vperm.xlu0 %648, %v238_v2   ;;  %v230_v7 = vld [vmem:[%s940_s30 + $0x10] sm:$0xff]  ;;  %v228_v8 = vld [vmem:[%s940_s30] sm:$0xff]  ;;  %v231_v13 = vld [vmem:[%s940_s30 + $0x18] sm:$0xff]  ;;  %v574_v20 = vmul.f32 -1.442695, %v229_v14 }
  0x46   : > { %650 = vset.pattern.permute.xlu2 %v815_v3  ;;  %v575_v9 = vmul.f32 -1.442695, %v230_v7  ;;  %v573_v10 = vmul.f32 -1.442695, %v228_v8  ;;  %v232_v12 = vld [vmem:[%s940_s30 + $0x20] sm:$0x7] }
  0x47   : > { %415 = vperm.xlu2 %650, %v242_v4   ;;  %v577_v17 = vmul.f32 -1.442695, %v232_v12  ;;  %v576_v19 = vmul.f32 -1.442695, %v231_v13  ;;  %v233_v55 = vld [vmem:[%s946_s6] sm:$0xff] }
  0x48   : > { %651 = vpow2.f32 %v575_v9 }
  0x49   : > { %653 = vpow2.f32 %v573_v10 }
  0x4d   : > { %410 = vperm.xlu1 %649, %v241_v5   ;;  %400 = vperm.xlu0 %648, %v239_v6  }
  0x4e   : > { %v652_v11 = vpop.eup %651 }
  0x4f   : > { %v654_v15 = vpop.eup %653  ;;  %v260_v16 = vadd.f32 1.0, %v652_v11  ;;  %v424_v11 = vlaneseq }
  0x50   : > { %v973_v18 = vadd.f32 1.0, %v654_v15 }
  0x51   : > { %655 = vrcp.f32 %v260_v16  ;;  %vm298_vm0 = vweird.f32 %v260_v16  ;;  %v304_v43 = vand.u32 2147483648, %v260_v16  ;;  %v302_v49 = vand.u32 2147483647, %v260_v16 }
  0x52   : > { %657 = vrcp.f32 %v973_v18  ;;  %vm268_vm4 = vweird.f32 %v973_v18  ;;  %v274_v52 = vand.u32 2147483648, %v973_v18  ;;  %v272_v56 = vand.u32 2147483647, %v973_v18 }
  0x53   : > { %659 = vpow2.f32 %v577_v17  ;;  %v305_v59 = vor.u32 1.1754944e-38, %v304_v43  ;;  %vm303_vm10 = vcmp.eq.f32.partialorder %v302_v49, 8.507059e+37 }
  0x54   : > { %661 = vpow2.f32 %v576_v19  ;;  %v275_v1 = vor.u32 1.1754944e-38, %v274_v52  ;;  %vm273_vm11 = vcmp.eq.f32.partialorder %v272_v56, 8.507059e+37 }
  0x55   : > { %663 = vpow2.f32 %v574_v20 }
  0x57   : > { %v976_v21 = vpop.eup %655 }
  0x58   : > { %v978_v22 = vpop.eup %657  ;;  %v294_v28 = vmul.f32 %v976_v21, %v260_v16  ;;  %vm299_vm1 = vweird.f32 %v976_v21  ;;  %v237_v16 = vld [vmem:[%s946_s6 + $0x20] sm:$0x7] }
  0x59   : > { %v660_v23 = vpop.eup %659  ;;  %v264_v29 = vmul.f32 %v978_v22, %v973_v18  ;;  %vm269_vm5 = vweird.f32 %v978_v22  ;;  %vm1001_vm7 = vmor %vm298_vm0, %vm299_vm1 }
  0x5a   : > { %v662_v24 = vpop.eup %661  ;;  %v262_v25 = vadd.f32 1.0, %v660_v23  ;;  %v295_v31 = vsub.f32 1.0, %v294_v28  ;;  %vm1009_vm9 = vmor %vm268_vm4, %vm269_vm5 }
  0x5b   : > { %v664_v26 = vpop.eup %663  ;;  %v980_v27 = vadd.f32 1.0, %v662_v24  ;;  %v265_v33 = vsub.f32 1.0, %v264_v29  ;;  %v362_v24 = vsub.f32 1.0, %v237_v16 }
  0x5c   : > { %665 = vrcp.f32 %v262_v25  ;;  %v986_v30 = vadd.f32 1.0, %v664_v26  ;;  %v296_v36 = vmul.f32 %v976_v21, %v295_v31  ;;  %v334_v39 = vand.u32 2147483648, %v262_v25 }
  0x5d   : > { %667 = vrcp.f32 %v980_v27  ;;  %v266_v38 = vmul.f32 %v978_v22, %v265_v33  ;;  %vm328_vm2 = vweird.f32 %v262_v25  ;;  %v332_v44 = vand.u32 2147483647, %v262_v25 }
  0x5e   : > { %669 = vrcp.f32 %v986_v30  ;;  %v335_v45 = vor.u32 1.1754944e-38, %v334_v39  ;;  %v297_v46 = vadd.f32 %v976_v21, %v296_v36  ;;  %vm313_vm12 = vweird.f32 %v980_v27 }
  0x5f   : > { %vm333_vm8 = vcmp.eq.f32.partialorder %v332_v44, 8.507059e+37  ;;  %v267_v51 = vadd.f32 %v978_v22, %v266_v38  ;;  %v317_v4 = vand.u32 2147483647, %v980_v27  ;;  %v319_v5 = vand.u32 2147483648, %v980_v27 }
  0x60   : > { %v301_v58 = vsel %vm1001_vm7, %v976_v21, %v297_v46  ;;  %vm283_vm14 = vweird.f32 %v986_v30  ;;  %v289_v10 = vand.u32 2147483648, %v986_v30  ;;  %v287_v14 = vand.u32 2147483647, %v986_v30 }
  0x61   : > { %v271_v0 = vsel %vm1009_vm9, %v978_v22, %v267_v51  ;;  %v306_v3 = vsel %vm303_vm10, %v305_v59, %v301_v58  ;;  %v320_v17 = vor.u32 1.1754944e-38, %v319_v5  ;;  %v426_v22 = vstv %s578_s29  ;;  %v236_v5 = vld [vmem:[%s946_s6 + $0x18] sm:$0xff] }
  0x62   : > { %v666_v32 = vpop.eup %665  ;;  %v276_v8 = vsel %vm273_vm11, %v275_v1, %v271_v0  ;;  %v365_v12 = vsub.f32 1.0, %v306_v3  ;;  %v340_v23 = vadd.f32 1e-06, %v306_v3 }
  0x63   : > { %v989_v34 = vpop.eup %667  ;;  %v324_v35 = vmul.f32 %v666_v32, %v262_v25  ;;  %vm329_vm3 = vweird.f32 %v666_v32  ;;  %v363_v19 = vsub.f32 1.0, %v276_v8  ;;  %v290_v25 = vor.u32 1.1754944e-38, %v289_v10 }
  0x64   : > { %v309_v40 = vmul.f32 %v989_v34, %v980_v27  ;;  %v996_v42 = vpop.eup %669  ;;  %vm330_vm6 = vmor %vm328_vm2, %vm329_vm3  ;;  %vm314_vm13 = vweird.f32 %v989_v34  ;;  %vm318_vm2 = vcmp.eq.f32.partialorder %v317_v4, 8.507059e+37  ;;  %v425_v27 = vand.u32 127, %v424_v11 }
  0x65   : > { %v325_v37 = vsub.f32 1.0, %v324_v35  ;;  %v279_v54 = vmul.f32 %v996_v42, %v986_v30  ;;  %vm284_vm15 = vweird.f32 %v996_v42  ;;  %vm1029_vm0 = vmor %vm313_vm12, %vm314_vm13  ;;  %v370_v28 = vadd.f32 1e-06, %v365_v12 }
  0x66   : > { %v310_v50 = vsub.f32 1.0, %v309_v40  ;;  %vm1038_vm1 = vmor %vm283_vm14, %vm284_vm15  ;;  %vm288_vm3 = vcmp.eq.f32.partialorder %v287_v14, 8.507059e+37  ;;  %v338_v30 = vadd.f32 1e-06, %v276_v8  ;;  %v368_v35 = vadd.f32 1e-06, %v363_v19 }
  0x67   : > { %v326_v41 = vmul.f32 %v666_v32, %v325_v37  ;;  %v280_v63 = vsub.f32 1.0, %v279_v54  ;;  %v1048_v37 = vadd.s32 %v426_v22, %v425_v27  ;;  %v361_v10 = vsub.f32 1.0, %v236_v5  ;;  %v434_v22 = vld [vmem:[#allocation2 + $0x8] sm:$0xff] }
  0x68   : > { %v311_v62 = vmul.f32 %v989_v34, %v310_v50 }
  0x69   : > { %v327_v47 = vadd.f32 %v666_v32, %v326_v41  ;;  %v281_v6 = vmul.f32 %v996_v42, %v280_v63  ;;  %vm428_vm4 = vcmp.lt.s32.totalorder %v1048_v37, 333 }
  0x6a   : > { %v312_v7 = vadd.f32 %v989_v34, %v311_v62 }
  0x6b   : > { %v331_v53 = vsel %vm330_vm6, %v666_v32, %v327_v47  ;;  %v282_v13 = vadd.f32 %v996_v42, %v281_v6 }
  0x6c   : > { %v336_v57 = vsel %vm333_vm8, %v335_v45, %v331_v53  ;;  %v316_v21 = vsel %vm1029_vm0, %v989_v34, %v312_v7  ;;  %v235_v53 = vld [vmem:[%s946_s6 + $0x10] sm:$0xff]  ;;  %v234_v7 = vld [vmem:[%s946_s6 + $0x8] sm:$0xff] }
  0x6d   : > { %v342_v60 = vadd.f32 1e-06, %v336_v57  ;;  %v367_v61 = vsub.f32 1.0, %v336_v57  ;;  %v286_v29 = vsel %vm1038_vm1, %v996_v42, %v282_v13  ;;  %v321_v33 = vsel %vm318_vm2, %v320_v17, %v316_v21  ;;  %v438_v42 = vld [vmem:[#allocation2 + $0x18] sm:$0x7] }
  0x6e   : > { %v291_v36 = vsel %vm288_vm3, %v290_v25, %v286_v29  ;;  %v366_v39 = vsub.f32 1.0, %v321_v33  ;;  %v341_v44 = vadd.f32 1e-06, %v321_v33  ;;  %v360_v57 = vsub.f32 1.0, %v235_v53 }
  0x6f   : > { %671 = vlog2.f32 %v342_v60  ;;  %v372_v2 = vadd.f32 1e-06, %v367_v61  ;;  %v364_v41 = vsub.f32 1.0, %v291_v36  ;;  %v339_v48 = vadd.f32 1e-06, %v291_v36  ;;  %v435_v36 = vld [vmem:[#allocation2] sm:$0xff] }
  0x70   : > { %v371_v45 = vadd.f32 1e-06, %v366_v39  ;;  %v358_v60 = vsub.f32 1.0, %v233_v55  ;;  %v359_v14 = vsub.f32 1.0, %v234_v7 }
  0x71   : > { %673 = vlog2.f32 %v372_v2  ;;  %v369_v51 = vadd.f32 1e-06, %v364_v41 }
  0x72   : > { %675 = vlog2.f32 %v340_v23 }
  0x73   : > { %677 = vlog2.f32 %v370_v28 }
  0x74   : > { %679 = vlog2.f32 %v338_v30 }
  0x75   : > { %v672_v15 = vpop.eup %671  ;;  %681 = vlog2.f32 %v368_v35  ;;  %v437_v35 = vld [vmem:[#allocation2 + $0x10] sm:$0xff] }
  0x76   : > { %v352_v20 = vmul.f32 0.6931472, %v672_v15  ;;  %683 = vlog2.f32 %v341_v44 }
  0x77   : > { %v674_v26 = vpop.eup %673  ;;  %685 = vlog2.f32 %v371_v45 }
  0x78   : > { %v357_v31 = vmul.f32 %v352_v20, %v237_v16  ;;  %v382_v32 = vmul.f32 0.6931472, %v674_v26  ;;  %v676_v46 = vpop.eup %675  ;;  %687 = vlog2.f32 %v339_v48  ;;  %v436_v20 = vld [vmem:[#allocation2 + $0x20] sm:$0xff] }
  0x79   : > { %v678_v49 = vpop.eup %677  ;;  %v348_v56 = vmul.f32 0.6931472, %v676_v46  ;;  %689 = vlog2.f32 %v369_v51 }
  0x7a   : > { %v387_v34 = vmul.f32 %v382_v32, %v362_v24  ;;  %v680_v52 = vpop.eup %679  ;;  %v378_v58 = vmul.f32 0.6931472, %v678_v49 }
  0x7b   : > { %v682_v54 = vpop.eup %681  ;;  %v344_v59 = vmul.f32 0.6931472, %v680_v52  ;;  %v355_v0 = vmul.f32 %v348_v56, %v235_v53 }
  0x7c   : > { %v392_v40 = vadd.f32 %v387_v34, %v357_v31  ;;  %v374_v61 = vmul.f32 0.6931472, %v682_v54  ;;  %v684_v62 = vpop.eup %683  ;;  %v385_v1 = vmul.f32 %v378_v58, %v360_v57 }
  0x7d   : > { %v686_v63 = vpop.eup %685  ;;  %v353_v3 = vmul.f32 %v344_v59, %v233_v55  ;;  %v350_v9 = vmul.f32 0.6931472, %v684_v62 }
  0x7e   : > { %v688_v2 = vpop.eup %687  ;;  %v383_v4 = vmul.f32 %v374_v61, %v358_v60  ;;  %v390_v8 = vadd.f32 %v385_v1, %v355_v0  ;;  %v380_v11 = vmul.f32 0.6931472, %v686_v63 }
  0x7f   : > { %v690_v6 = vpop.eup %689  ;;  %v346_v13 = vmul.f32 0.6931472, %v688_v2  ;;  %v356_v18 = vmul.f32 %v350_v9, %v236_v5 }
  0x80   : > { %v388_v12 = vadd.f32 %v383_v4, %v353_v3  ;;  %v376_v15 = vmul.f32 0.6931472, %v690_v6  ;;  %v386_v19 = vmul.f32 %v380_v11, %v361_v10 }
  0x81   : > { %v354_v24 = vmul.f32 %v346_v13, %v234_v7 }
  0x82   : > { %v384_v25 = vmul.f32 %v376_v15, %v359_v14  ;;  %v391_v30 = vadd.f32 %v386_v19, %v356_v18 }
  0x84   : > { %v389_v31 = vadd.f32 %v384_v25, %v354_v24 }
  0xa1   : > { %v416_v38 = vpop.permute.xlu2 %415 }
  0xa2   : > { %v422_v43 = vmul.f32 %v416_v38, %v392_v40 }
  0xa4   : > { %v433_v47 = vsel %vm428_vm4, %v422_v43, 0.0 }
  0xa5   : > { %v443_v50 = vadd.f32 %v438_v42, %v433_v47 }
  0xa7   : > { %448 = vst [vmem:[#allocation2 + $0x18] sm:$0x7] %v443_v50 }
  0xb7   : > { %v406_v16 = vpop.permute.xlu1 %405  ;;  %v396_v17 = vpop.permute.xlu0 %395 }
  0xb8   : > { %v420_v21 = vmul.f32 %v406_v16, %v390_v8  ;;  %v418_v23 = vmul.f32 %v396_v17, %v388_v12 }
  0xba   : > { %v431_v26 = vsel %vm428_vm4, %v420_v21, 0.0  ;;  %v429_v27 = vsel %vm428_vm4, %v418_v23, 0.0 }
  0xbb   : > { %v441_v28 = vadd.f32 %v436_v20, %v431_v26  ;;  %v439_v29 = vadd.f32 %v434_v22, %v429_v27 }
  0xbd   : > { %446 = vst [vmem:[#allocation2 + $0x20] sm:$0xff] %v441_v28 }
  0xbe   : > { %444 = vst [vmem:[#allocation2 + $0x8] sm:$0xff] %v439_v29 }
  0xbf   : > { %v411_v32 = vpop.permute.xlu1 %410  ;;  %v401_v33 = vpop.permute.xlu0 %400 }
  0xc0   : > { %v421_v34 = vmul.f32 %v411_v32, %v391_v30  ;;  %v419_v38 = vmul.f32 %v401_v33, %v389_v31 }
  0xc2   : > { %v432_v39 = vsel %vm428_vm4, %v421_v34, 0.0  ;;  %v430_v40 = vsel %vm428_vm4, %v419_v38, 0.0  ;;  %452 = sbr.rel (%p579_p7) target bundleno = 397 (0x18d), region = 48 }
  0xc3   : > { %v442_v41 = vadd.f32 %v437_v35, %v432_v39  ;;  %v440_v42 = vadd.f32 %v435_v36, %v430_v40 }
  0xc5   : > { %447 = vst [vmem:[#allocation2 + $0x10] sm:$0xff] %v442_v41 }
  0xc6   : > { %445 = vst [vmem:[#allocation2] sm:$0xff] %v440_v42 }
  0xc7   : > { %v453_v43 = vld [vmem:[#allocation2 + $0x8] sm:$0xff]  ;;  %v455_v45 = vld [vmem:[#allocation2 + $0x20] sm:$0xff]  ;;  %v457_v46 = vld [vmem:[#allocation2 + $0x18] sm:$0x7]  ;;  %vm461_vm5 = vcmask 1042432  }
  0xc8   : > { %v462_v50 = vsel %vm461_vm5, %v457_v46, 0.0  ;;  %v816_v37 = vmov 11655.0  }
  0xc9   : > { %691 = vrcp.f32 %v816_v37 }
  0xcc   : > { %v456_v48 = vld [vmem:[#allocation2 + $0x10] sm:$0xff] }
  0xcd   : > { %v454_v44 = vld [vmem:[#allocation2] sm:$0xff] }
  0xce   : > { %v458_v47 = vadd.f32 %v454_v44, %v453_v43 }
  0xcf   : > { %v692_v53 = vpop.eup %691 }
  0xd0   : > { %v459_v49 = vadd.f32 %v458_v47, %v455_v45  ;;  %v475_v54 = vmul.f32 11655.0, %v692_v53  ;;  %vm479_vm6 = vweird.f32 %v692_v53 }
  0xd2   : > { %v460_v51 = vadd.f32 %v459_v49, %v456_v48  ;;  %v476_v55 = vsub.f32 1.0, %v475_v54 }
  0xd4   : > { %v463_v52 = vadd.f32 %v462_v50, %v460_v51  ;;  %v477_v59 = vmul.f32 %v692_v53, %v476_v55 }
  0xd6   : > { %464 = vadd.xlane.f32.xlu0 %v463_v52  ;;  %v478_v62 = vadd.f32 %v692_v53, %v477_v59 }
  0xd8   : > { %v480_v1 = vsel %vm479_vm6, %v692_v53, %v478_v62 }
 0x149   : > { %v465_v56 = vpop.xlane.xlu0 %464 }
 0x14a   : > { %v466_v57 = vrot.slane %v465_v56, 4 }
 0x14c   : > { %v467_v58 = vadd.f32 %v466_v57, %v465_v56 }
 0x14e   : > { %v468_v60 = vrot.slane %v467_v58, 2 }
 0x150   : > { %v469_v61 = vadd.f32 %v468_v60, %v467_v58 }
 0x152   : > { %v470_v63 = vrot.slane %v469_v61, 1 }
 0x154   : > { %v471_v0 = vadd.f32 %v470_v63, %v469_v61 }
 0x156   : > { %587 = vpush %v471_v0 }
 0x157   : > { %589 = vpush %v480_v1 }
 0x187   : > { %s588_s15 = spop %587 }
 0x188   : > { %s473_s4 = ssub.f32 0.0, %s588_s15  ;;  %s590_s5 = spop %589 }
 0x18a   : > { %s482_s24 = smul.f32 %s590_s5, %s473_s4 }
 0x18c   : > { %484 = sst [smem:[#allocation8]] %s482_s24 }
 0x18d PF: > { %p607_p10 = scmp.eq.s32.totalorder %s857_s16, 2  ;;  %s491_s23 = sshll.u32 %s1086_s3, 4  ;;  %s492_s23 = int_to_ptr.hbm [resolvable:$true] %s491_s23 }
 0x18e   : > { %s817_s28 = smov [#allocation8]  }
 0x18f   : > { %596 = dma.smem_to_hbm (%p607_p10), %s817_s28, 16, %s492_s23, [#allocation5]  }
 0x190   : > { %792 = dma.done.wait (%p607_p10), [#allocation5], 16  }
 0x191   : > { %794 = vsyncadd (%p607_p10), [#allocation5], 4294967280 }
 0x192   : > { %500 = sfence }
 0x193 PF: > { %p17_p2 = scmp.ge.s32.totalorder %s860_s17, 5   ;;  %s1098_s12 = smov %s801_s13 }
 0x194   : > { %s1099_s13 = smov %s805_s14  ;;  %s1100_s14 = smov %s870_s20 }
 0x195   : > { %s1101_s15 = smov %s860_s17  ;;  %19 = sbr.rel (!%p17_p2) target bundleno = 6 (0x6), region = 91 }
 0x19a   :  { %506 = vsyncpa [#allocation4], 1 }
 0x19b   :  { %508 = vsyncpa [#allocation4 + $0x1], 1 }
 0x19c   :  { %509 = vsyncpa [#allocation7], 1 }
 0x19d   :  { %511 = vsyncpa [#allocation7 + $0x1], 1 }
 0x19e   :  { %512 = vsyncpa [#allocation5], 1 }
 0x19f   :  { %514 = vsyncpa [#allocation5 + $0x1], 1 }

</bundles_post_ra>
